<compile_context>
chip_gen: v7x
topology: tpu7x:2x2x1
jax: 0.10.0
libtpu: 0.0.40
codegen_flags: <defaults>
</compile_context>

<pallas_src>
import functools

import jax
import jax.numpy as jnp
from jax.experimental import pallas as pl
from jax.experimental.pallas import tpu as pltpu


def _round_up(x, m):
    return ((x + m - 1) // m) * m


def _mlp_kernel(x_ref, w1_ref, b1_ref, w2_ref, b2_ref, w3_ref, b3_ref, o_ref):
    # Layer 1: Linear + ReLU (MXU matmul, f32 accumulation; bias/ReLU in f32).
    h = jnp.dot(x_ref[...], w1_ref[...], preferred_element_type=jnp.float32)
    h = jnp.maximum(h + b1_ref[...], 0.0)
    # Layer 2: Linear + ReLU (cast activations back to the MXU operand dtype).
    h = jnp.dot(h.astype(w2_ref.dtype), w2_ref[...],
                preferred_element_type=jnp.float32)
    h = jnp.maximum(h + b2_ref[...], 0.0)
    # Layer 3: Linear (logits, no activation).
    out = jnp.dot(h.astype(w3_ref.dtype), w3_ref[...],
                  preferred_element_type=jnp.float32)
    o_ref[...] = (out + b3_ref[...]).astype(o_ref.dtype)


@functools.partial(jax.jit, static_argnames=("block_b", "matmul_dtype"))
def neural_net_forward(x, w1, b1, w2, b2, w3, b3, *, block_b=None,
                       matmul_dtype=None):
    """x: (B, input_size); w*: (in, out) [already transposed]; b*: (1, out)."""
    B, in_size = x.shape
    hidden = w1.shape[1]
    num_classes = w3.shape[1]
    out_dtype = x.dtype

    LANE = 128
    in_p = _round_up(in_size, LANE)
    hid_p = _round_up(hidden, LANE)
    cls_p = _round_up(num_classes, LANE)

    # Batch tile: >=128 rows for MXU utilization, capped at 256 so large
    # batches keep a multi-step grid axis that can be sharded across cores.
    if block_b is None:
        block_b = min(256, _round_up(B, 128))
    block_b = _round_up(block_b, 16)  # bf16 sublane packing is 16 rows
    B_p = _round_up(B, block_b)

    mm_dtype = jnp.dtype(matmul_dtype) if matmul_dtype is not None else x.dtype

    def pad2(a, rows, cols, dtype):
        return jnp.pad(a, ((0, rows - a.shape[0]),
                           (0, cols - a.shape[1]))).astype(dtype)

    x_p = pad2(x, B_p, in_p, mm_dtype)
    w1_p = pad2(w1, in_p, hid_p, mm_dtype)
    w2_p = pad2(w2, hid_p, hid_p, mm_dtype)
    w3_p = pad2(w3, hid_p, cls_p, mm_dtype)
    # Bias + activation math stays in f32 (v5e VPU has no bf16 path).
    b1_p = pad2(b1, 1, hid_p, jnp.float32)
    b2_p = pad2(b2, 1, hid_p, jnp.float32)
    b3_p = pad2(b3, 1, cls_p, jnp.float32)

    grid = (B_p // block_b,)
    full = lambda i: (0, 0)  # weights/biases: same (single) block every step

    # VMEM budget: double-buffered x/out tiles + resident weights, with 2x
    # margin; clamped below the v7x 64 MiB physical VMEM.
    mm_bytes = jnp.dtype(mm_dtype).itemsize
    tile_bytes = 2 * block_b * (in_p * mm_bytes + cls_p * 4)
    weight_bytes = 2 * (in_p * hid_p + hid_p * hid_p + hid_p * cls_p) * mm_bytes
    vmem_bytes = int(min(max(2 * (tile_bytes + weight_bytes) + (4 << 20),
                             32 << 20), 56 << 20))

    # Advisory cost hint for the XLA scheduler around the custom call.
    flops = 2 * B_p * (in_p * hid_p + hid_p * hid_p + hid_p * cls_p)
    bytes_accessed = (x_p.size * mm_bytes + out_dtype.itemsize * B_p * cls_p
                      + (w1_p.size + w2_p.size + w3_p.size) * mm_bytes
                      + 4 * (b1_p.size + b2_p.size + b3_p.size))
    cost = pl.CostEstimate(flops=flops, transcendentals=0,
                           bytes_accessed=int(bytes_accessed))

    out_p = pl.pallas_call(
        _mlp_kernel,
        out_shape=jax.ShapeDtypeStruct((B_p, cls_p), out_dtype),
        grid_spec=pl.GridSpec(
            grid=grid,
            in_specs=[
                pl.BlockSpec((block_b, in_p), lambda i: (i, 0)),   # x tile
                pl.BlockSpec((in_p, hid_p), full),                 # W1
                pl.BlockSpec((1, hid_p), full),                    # b1
                pl.BlockSpec((hid_p, hid_p), full),                # W2
                pl.BlockSpec((1, hid_p), full),                    # b2
                pl.BlockSpec((hid_p, cls_p), full),                # W3
                pl.BlockSpec((1, cls_p), full),                    # b3
            ],
            out_specs=pl.BlockSpec((block_b, cls_p), lambda i: (i, 0)),
        ),
        compiler_params=pltpu.CompilerParams(
            dimension_semantics=("parallel",),
            vmem_limit_bytes=vmem_bytes,
        ),
        cost_estimate=cost,
    )(x_p, w1_p, b1_p, w2_p, b2_p, w3_p, b3_p)

    # Strip batch + class padding.
    return out_p[:B, :num_classes]


def init_linear_params(key, in_features, out_features, dtype=jnp.float32):
    """PyTorch-style init: U(-1/sqrt(fan_in), 1/sqrt(fan_in)).
    Weight is returned already transposed to (in_features, out_features)."""
    kw, kb = jax.random.split(key)
    bound = 1.0 / jnp.sqrt(jnp.asarray(in_features, dtype))
    w = jax.random.uniform(kw, (in_features, out_features), dtype, -bound, bound)
    b = jax.random.uniform(kb, (1, out_features), dtype, -bound, bound)
    return w, b


if __name__ == "__main__":
    # Small shapes consistent with the module's forward.
    batch = 16
    input_size = 32
    hidden_size = 64
    num_classes = 16

    key = jax.random.PRNGKey(0)
    kx, k1, k2, k3 = jax.random.split(key, 4)

    x = jax.random.normal(kx, (batch, input_size), jnp.float32)
    w1, b1 = init_linear_params(k1, input_size, hidden_size)
    w2, b2 = init_linear_params(k2, hidden_size, hidden_size)
    w3, b3 = init_linear_params(k3, hidden_size, num_classes)

    # Pure-JAX reference of the same forward pass.
    ref = jnp.maximum(x @ w1 + b1, 0.0)
    ref = jnp.maximum(ref @ w2 + b2, 0.0)
    ref = ref @ w3 + b3

    # f32 matmul path: exact parity with the reference.
    out_f32 = jax.block_until_ready(
        neural_net_forward(x, w1, b1, w2, b2, w3, b3))
    assert out_f32.shape == (batch, num_classes)
    assert jnp.allclose(out_f32, ref, atol=1e-5, rtol=1e-5), "f32 mismatch"

    # bf16 matmul operands (v6e/v7x MXU fast path), f32 accumulation.
    out_bf16 = jax.block_until_ready(
        neural_net_forward(x, w1, b1, w2, b2, w3, b3,
                           matmul_dtype=jnp.bfloat16))
    assert out_bf16.shape == (batch, num_classes)
    assert jnp.allclose(out_bf16, ref, atol=5e-2, rtol=5e-2), "bf16 mismatch"

    print("KERNEL_OK")
</pallas_src>

<mosaic_0001>
module attributes {stable_mosaic.version = 11 : i64} {
  func.func @_mlp_kernel(%arg0: i32, %arg1: memref<128x128xf32, #tpu.memory_space<vmem>>, %arg2: memref<128x128xf32, #tpu.memory_space<vmem>>, %arg3: memref<1x128xf32, #tpu.memory_space<vmem>>, %arg4: memref<128x128xf32, #tpu.memory_space<vmem>>, %arg5: memref<1x128xf32, #tpu.memory_space<vmem>>, %arg6: memref<128x128xf32, #tpu.memory_space<vmem>>, %arg7: memref<1x128xf32, #tpu.memory_space<vmem>>, %arg8: memref<128x128xf32, #tpu.memory_space<vmem>>) attributes {dimension_semantics = [#tpu.dimension_semantics<parallel>], iteration_bounds = array<i64: 1>, scalar_prefetch = 0 : i64, scratch_operands = 0 : i64, tpu.core_type = #tpu.core_type<tc>, window_params = [{transform_indices = @transform_0, window_bounds = array<i64: 128, 128>}, {pipeline_mode = #tpu.pipeline_mode<synchronous>, transform_indices = @transform_1, window_bounds = array<i64: 128, 128>}, {pipeline_mode = #tpu.pipeline_mode<synchronous>, transform_indices = @transform_2, window_bounds = array<i64: 1, 128>}, {pipeline_mode = #tpu.pipeline_mode<synchronous>, transform_indices = @transform_3, window_bounds = array<i64: 128, 128>}, {pipeline_mode = #tpu.pipeline_mode<synchronous>, transform_indices = @transform_4, window_bounds = array<i64: 1, 128>}, {pipeline_mode = #tpu.pipeline_mode<synchronous>, transform_indices = @transform_5, window_bounds = array<i64: 128, 128>}, {pipeline_mode = #tpu.pipeline_mode<synchronous>, transform_indices = @transform_6, window_bounds = array<i64: 1, 128>}, {transform_indices = @transform_7, window_bounds = array<i64: 128, 128>}]} {
    %c0 = arith.constant 0 : index
    %c0_0 = arith.constant 0 : index
    %0 = vector.load %arg1[%c0, %c0_0] : memref<128x128xf32, #tpu.memory_space<vmem>>, vector<128x128xf32>
    %c0_1 = arith.constant 0 : index
    %c0_2 = arith.constant 0 : index
    %1 = vector.load %arg2[%c0_1, %c0_2] : memref<128x128xf32, #tpu.memory_space<vmem>>, vector<128x128xf32>
    %cst = arith.constant dense<0.000000e+00> : vector<128x128xf32>
    %2 = tpu.matmul %0, %1, %cst {dimension_numbers = #tpu.dot_dimension_numbers<[1], [0], [0], [1], [0, 0, 1, 1], [], []>} : vector<128x128xf32>, vector<128x128xf32>, vector<128x128xf32> -> vector<128x128xf32>
    %c0_3 = arith.constant 0 : index
    %c0_4 = arith.constant 0 : index
    %3 = vector.load %arg3[%c0_3, %c0_4] : memref<1x128xf32, #tpu.memory_space<vmem>>, vector<1x128xf32>
    %4 = vector.broadcast %3 : vector<1x128xf32> to vector<128x128xf32>
    %5 = arith.addf %2, %4 : vector<128x128xf32>
    %cst_5 = arith.constant 0.000000e+00 : f32
    %6 = vector.broadcast %cst_5 : f32 to vector<128x128xf32>
    %7 = arith.maximumf %5, %6 : vector<128x128xf32>
    %c0_6 = arith.constant 0 : index
    %c0_7 = arith.constant 0 : index
    %8 = vector.load %arg4[%c0_6, %c0_7] : memref<128x128xf32, #tpu.memory_space<vmem>>, vector<128x128xf32>
    %cst_8 = arith.constant dense<0.000000e+00> : vector<128x128xf32>
    %9 = tpu.matmul %7, %8, %cst_8 {dimension_numbers = #tpu.dot_dimension_numbers<[1], [0], [0], [1], [0, 0, 1, 1], [], []>} : vector<128x128xf32>, vector<128x128xf32>, vector<128x128xf32> -> vector<128x128xf32>
    %c0_9 = arith.constant 0 : index
    %c0_10 = arith.constant 0 : index
    %10 = vector.load %arg5[%c0_9, %c0_10] : memref<1x128xf32, #tpu.memory_space<vmem>>, vector<1x128xf32>
    %11 = vector.broadcast %10 : vector<1x128xf32> to vector<128x128xf32>
    %12 = arith.addf %9, %11 : vector<128x128xf32>
    %cst_11 = arith.constant 0.000000e+00 : f32
    %13 = vector.broadcast %cst_11 : f32 to vector<128x128xf32>
    %14 = arith.maximumf %12, %13 : vector<128x128xf32>
    %c0_12 = arith.constant 0 : index
    %c0_13 = arith.constant 0 : index
    %15 = vector.load %arg6[%c0_12, %c0_13] : memref<128x128xf32, #tpu.memory_space<vmem>>, vector<128x128xf32>
    %cst_14 = arith.constant dense<0.000000e+00> : vector<128x128xf32>
    %16 = tpu.matmul %14, %15, %cst_14 {dimension_numbers = #tpu.dot_dimension_numbers<[1], [0], [0], [1], [0, 0, 1, 1], [], []>} : vector<128x128xf32>, vector<128x128xf32>, vector<128x128xf32> -> vector<128x128xf32>
    %c0_15 = arith.constant 0 : index
    %c0_16 = arith.constant 0 : index
    %17 = vector.load %arg7[%c0_15, %c0_16] : memref<1x128xf32, #tpu.memory_space<vmem>>, vector<1x128xf32>
    %18 = vector.broadcast %17 : vector<1x128xf32> to vector<128x128xf32>
    %19 = arith.addf %16, %18 : vector<128x128xf32>
    %c0_17 = arith.constant 0 : index
    %c0_18 = arith.constant 0 : index
    %20 = vector.load %arg8[%c0_17, %c0_18] : memref<128x128xf32, #tpu.memory_space<vmem>>, vector<128x128xf32>
    tpu.vector_store %arg8[%c0_17, %c0_18], %19 {strides = array<i32>} : memref<128x128xf32, #tpu.memory_space<vmem>>, vector<128x128xf32>,
    return
  }
  func.func @transform_0(%arg0: i32) -> (i32, i32) {
    %c0_i32 = arith.constant 0 : i32
    %c0_i32_0 = arith.constant 0 : i32
    return %arg0, %c0_i32 : i32, i32
  }
  func.func @transform_1(%arg0: i32) -> (i32, i32) {
    %c0_i32 = arith.constant 0 : i32
    %c0_i32_0 = arith.constant 0 : i32
    %c0_i32_1 = arith.constant 0 : i32
    return %c0_i32, %c0_i32_0 : i32, i32
  }
  func.func @transform_2(%arg0: i32) -> (i32, i32) {
    %c0_i32 = arith.constant 0 : i32
    %c0_i32_0 = arith.constant 0 : i32
    %c0_i32_1 = arith.constant 0 : i32
    return %c0_i32, %c0_i32_0 : i32, i32
  }
  func.func @transform_3(%arg0: i32) -> (i32, i32) {
    %c0_i32 = arith.constant 0 : i32
    %c0_i32_0 = arith.constant 0 : i32
    %c0_i32_1 = arith.constant 0 : i32
    return %c0_i32, %c0_i32_0 : i32, i32
  }
  func.func @transform_4(%arg0: i32) -> (i32, i32) {
    %c0_i32 = arith.constant 0 : i32
    %c0_i32_0 = arith.constant 0 : i32
    %c0_i32_1 = arith.constant 0 : i32
    return %c0_i32, %c0_i32_0 : i32, i32
  }
  func.func @transform_5(%arg0: i32) -> (i32, i32) {
    %c0_i32 = arith.constant 0 : i32
    %c0_i32_0 = arith.constant 0 : i32
    %c0_i32_1 = arith.constant 0 : i32
    return %c0_i32, %c0_i32_0 : i32, i32
  }
  func.func @transform_6(%arg0: i32) -> (i32, i32) {
    %c0_i32 = arith.constant 0 : i32
    %c0_i32_0 = arith.constant 0 : i32
    %c0_i32_1 = arith.constant 0 : i32
    return %c0_i32, %c0_i32_0 : i32, i32
  }
  func.func @transform_7(%arg0: i32) -> (i32, i32) {
    %c0_i32 = arith.constant 0 : i32
    %c0_i32_0 = arith.constant 0 : i32
    return %arg0, %c0_i32 : i32, i32
  }
}

</mosaic_0001>

<bundles_post_ra>
// kernel: neural_net_forward.1
= control target key start
LH: loop header
LB: loop body
LE: loop exit
PB: predicated region body
PF: predicated region fallthrough
CT: control target
= control target key end

     0   :  { %s1308_s1 = inlined_call_operand.vmem [shape: f32[128,128], index: 1, kind: input, shape index: {}]   ;;  %s1309_s0 = inlined_call_operand.vmem [shape: f32[128,128], index: 0, kind: input, shape index: {}]   ;;  %s1310_s3 = inlined_call_operand.vmem [shape: f32[128,128], index: 3, kind: input, shape index: {}]   ;;  %s1311_s5 = inlined_call_operand.vmem [shape: f32[128,128], index: 5, kind: input, shape index: {}]   ;;  %s1312_s2 = inlined_call_operand.vmem [shape: f32[1,128], index: 2, kind: input, shape index: {}]   ;;  %s1313_s4 = inlined_call_operand.vmem [shape: f32[1,128], index: 4, kind: input, shape index: {}]   ;;  %s1314_s6 = inlined_call_operand.vmem [shape: f32[1,128], index: 6, kind: input, shape index: {}]   ;;  %s1315_s7 = inlined_call_operand.vmem [shape: f32[128,128], index: 7, kind: output, shape index: {}]  }
   0x1   :  { %v42_v0 = vld [vmem:[%s1308_s1] sm:$0xff]  ;;  %v43_v1 = vld [vmem:[%s1308_s1 + $0x8] sm:$0xff]  ;;  %v44_v2 = vld [vmem:[%s1308_s1 + $0x10] sm:$0xff] }
   0x2   :  { %v865_v3 = vpack.c.bf16 %v43_v1, %v42_v0  ;;  %v45_v4 = vld [vmem:[%s1308_s1 + $0x18] sm:$0xff]  ;;  %v46_v6 = vld [vmem:[%s1308_s1 + $0x20] sm:$0xff]  ;;  %v47_v7 = vld [vmem:[%s1308_s1 + $0x28] sm:$0xff] }
   0x3   :  { %v869_v5 = vpack.c.bf16 %v45_v4, %v44_v2  ;;  %v873_v8 = vpack.c.bf16 %v47_v7, %v46_v6  ;;  %v26_v9 = vld [vmem:[%s1309_s0] sm:$0xff]  ;;  %v48_v10 = vld [vmem:[%s1308_s1 + $0x30] sm:$0xff]  ;;  %v49_v11 = vld [vmem:[%s1308_s1 + $0x38] sm:$0xff] }
   0x4   :  { %866 = vmatprep.subr.bf16.mxu0 %v865_v3  ;;  %729 = vmatprep.mubr.f32.mxu0 %v26_v9  ;;  %v877_v12 = vpack.c.bf16 %v49_v11, %v48_v10  ;;  %v50_v13 = vld [vmem:[%s1308_s1 + $0x40] sm:$0xff]  ;;  %v51_v14 = vld [vmem:[%s1308_s1 + $0x48] sm:$0xff]  ;;  %v228_v17 = vld [vmem:[%s1310_s3 + $0x10] sm:$0xff] }
   0x5   :  { %868 = vmatpush3.bf16.msra.mxu0 %v865_v3  ;;  %v226_v15 = vld [vmem:[%s1310_s3] sm:$0xff]  ;;  %v227_v16 = vld [vmem:[%s1310_s3 + $0x8] sm:$0xff]  ;;  %v229_v18 = vld [vmem:[%s1310_s3 + $0x18] sm:$0xff]  ;;  %v881_v21 = vpack.c.bf16 %v51_v14, %v50_v13 }
   0x6   :  { %870 = vmatprep.subr.bf16.mxu0 %v869_v5  ;;  %v897_v19 = vpack.c.bf16 %v227_v16, %v226_v15  ;;  %v901_v20 = vpack.c.bf16 %v229_v18, %v228_v17  ;;  %v230_v22 = vld [vmem:[%s1310_s3 + $0x20] sm:$0xff]  ;;  %v231_v23 = vld [vmem:[%s1310_s3 + $0x28] sm:$0xff]  ;;  %v52_v24 = vld [vmem:[%s1308_s1 + $0x50] sm:$0xff] }
   0x7   :  { %v53_v25 = vld [vmem:[%s1308_s1 + $0x58] sm:$0xff]  ;;  %v905_v26 = vpack.c.bf16 %v231_v23, %v230_v22  ;;  %v232_v28 = vld [vmem:[%s1310_s3 + $0x30] sm:$0xff]  ;;  %v54_v30 = vld [vmem:[%s1308_s1 + $0x60] sm:$0xff] }
   0x8   :  { %898 = vmatprep.subr.bf16.mxu1 %v897_v19  ;;  %v885_v27 = vpack.c.bf16 %v53_v25, %v52_v24  ;;  %v233_v29 = vld [vmem:[%s1310_s3 + $0x38] sm:$0xff]  ;;  %v55_v31 = vld [vmem:[%s1308_s1 + $0x68] sm:$0xff]  ;;  %v234_v34 = vld [vmem:[%s1310_s3 + $0x40] sm:$0xff] }
   0x9   :  { %872 = vmatpush3.bf16.msra.mxu0 %v869_v5  ;;  %900 = vmatpush3.bf16.msra.mxu1 %v897_v19  ;;  %v909_v32 = vpack.c.bf16 %v233_v29, %v232_v28  ;;  %v889_v33 = vpack.c.bf16 %v55_v31, %v54_v30  ;;  %v235_v35 = vld [vmem:[%s1310_s3 + $0x48] sm:$0xff]  ;;  %v56_v36 = vld [vmem:[%s1308_s1 + $0x70] sm:$0xff]  ;;  %v57_v37 = vld [vmem:[%s1308_s1 + $0x78] sm:$0xff] }
   0xa   :  { %874 = vmatprep.subr.bf16.mxu0 %v873_v8  ;;  %902 = vmatprep.subr.bf16.mxu1 %v901_v20  ;;  %v913_v38 = vpack.c.bf16 %v235_v35, %v234_v34  ;;  %v893_v39 = vpack.c.bf16 %v57_v37, %v56_v36  ;;  %v236_v40 = vld [vmem:[%s1310_s3 + $0x50] sm:$0xff]  ;;  %v237_v41 = vld [vmem:[%s1310_s3 + $0x58] sm:$0xff]  ;;  %v238_v43 = vld [vmem:[%s1310_s3 + $0x60] sm:$0xff] }
   0xb   :  { %v917_v42 = vpack.c.bf16 %v237_v41, %v236_v40  ;;  %v239_v44 = vld [vmem:[%s1310_s3 + $0x68] sm:$0xff]  ;;  %v28_v47 = vld [vmem:[%s1309_s0 + $0x10] sm:$0xff]  ;;  %v29_v48 = vld [vmem:[%s1309_s0 + $0x18] sm:$0xff] }
   0xc   :  { %v27_v45 = vld [vmem:[%s1309_s0 + $0x8] sm:$0xff]  ;;  %v921_v46 = vpack.c.bf16 %v239_v44, %v238_v43  ;;  %v30_v49 = vld [vmem:[%s1309_s0 + $0x20] sm:$0xff]  ;;  %v32_v51 = vld [vmem:[%s1309_s0 + $0x30] sm:$0xff] }
   0xd   :  { %876 = vmatpush3.bf16.msra.mxu0 %v873_v8  ;;  %904 = vmatpush3.bf16.msra.mxu1 %v901_v20  ;;  %v31_v50 = vld [vmem:[%s1309_s0 + $0x28] sm:$0xff]  ;;  %v33_v52 = vld [vmem:[%s1309_s0 + $0x38] sm:$0xff]  ;;  %v34_v53 = vld [vmem:[%s1309_s0 + $0x40] sm:$0xff] }
   0xe   :  { %878 = vmatprep.subr.bf16.mxu0 %v877_v12  ;;  %906 = vmatprep.subr.bf16.mxu1 %v905_v26  ;;  %v35_v54 = vld [vmem:[%s1309_s0 + $0x48] sm:$0xff]  ;;  %v36_v55 = vld [vmem:[%s1309_s0 + $0x50] sm:$0xff]  ;;  %v37_v56 = vld [vmem:[%s1309_s0 + $0x58] sm:$0xff] }
   0xf   :  { %v38_v57 = vld [vmem:[%s1309_s0 + $0x60] sm:$0xff]  ;;  %v39_v58 = vld [vmem:[%s1309_s0 + $0x68] sm:$0xff]  ;;  %v40_v59 = vld [vmem:[%s1309_s0 + $0x70] sm:$0xff] }
  0x10   :  { %v41_v60 = vld [vmem:[%s1309_s0 + $0x78] sm:$0xff]  ;;  %v240_v61 = vld [vmem:[%s1310_s3 + $0x70] sm:$0xff]  ;;  %v410_v0 = vld [vmem:[%s1311_s5] sm:$0xff] }
  0x11   :  { %880 = vmatpush3.bf16.msra.mxu0 %v877_v12  ;;  %908 = vmatpush3.bf16.msra.mxu1 %v905_v26  ;;  %v241_v62 = vld [vmem:[%s1310_s3 + $0x78] sm:$0xff]  ;;  %v411_v1 = vld [vmem:[%s1311_s5 + $0x8] sm:$0xff]  ;;  %v412_v2 = vld [vmem:[%s1311_s5 + $0x10] sm:$0xff] }
  0x12   :  { %882 = vmatprep.subr.bf16.mxu0 %v881_v21  ;;  %910 = vmatprep.subr.bf16.mxu1 %v909_v32  ;;  %v925_v63 = vpack.c.bf16 %v241_v62, %v240_v61  ;;  %v929_v3 = vpack.c.bf16 %v411_v1, %v410_v0  ;;  %v413_v4 = vld [vmem:[%s1311_s5 + $0x18] sm:$0xff]  ;;  %v414_v6 = vld [vmem:[%s1311_s5 + $0x20] sm:$0xff]  ;;  %v415_v7 = vld [vmem:[%s1311_s5 + $0x28] sm:$0xff] }
  0x13   :  { %v933_v5 = vpack.c.bf16 %v413_v4, %v412_v2  ;;  %v937_v8 = vpack.c.bf16 %v415_v7, %v414_v6  ;;  %v416_v9 = vld [vmem:[%s1311_s5 + $0x30] sm:$0xff]  ;;  %v417_v10 = vld [vmem:[%s1311_s5 + $0x38] sm:$0xff]  ;;  %v418_v12 = vld [vmem:[%s1311_s5 + $0x40] sm:$0xff] }
  0x14   :  { %v1185_v11 = vpack.c.bf16 %v417_v10, %v416_v9  ;;  %v419_v13 = vld [vmem:[%s1311_s5 + $0x48] sm:$0xff]  ;;  %v420_v15 = vld [vmem:[%s1311_s5 + $0x50] sm:$0xff]  ;;  %v421_v16 = vld [vmem:[%s1311_s5 + $0x58] sm:$0xff] }
  0x15   :  { %884 = vmatpush3.bf16.msra.mxu0 %v881_v21  ;;  %912 = vmatpush3.bf16.msra.mxu1 %v909_v32  ;;  %v1194_v14 = vpack.c.bf16 %v419_v13, %v418_v12  ;;  %v1204_v17 = vpack.c.bf16 %v421_v16, %v420_v15  ;;  %v422_v18 = vld [vmem:[%s1311_s5 + $0x60] sm:$0xff]  ;;  %v423_v19 = vld [vmem:[%s1311_s5 + $0x68] sm:$0xff]  ;;  %v424_v6 = vld [vmem:[%s1311_s5 + $0x70] sm:$0xff] }
  0x16   :  { %886 = vmatprep.subr.bf16.mxu0 %v885_v27  ;;  %914 = vmatprep.subr.bf16.mxu1 %v913_v38  ;;  %v1214_v20 = vpack.c.bf16 %v423_v19, %v422_v18  ;;  %v1222_v21 = vld [vmem:[%s1312_s2] ss:$0 sm:$0xff]  ;;  %v425_v7 = vld [vmem:[%s1311_s5 + $0x78] sm:$0xff] }
  0x17   :  { %v599_v9 = vld [vmem:[%s1313_s4] ss:$0 sm:$0xff] }
  0x19   :  { %888 = vmatpush3.bf16.msra.mxu0 %v885_v27  ;;  %916 = vmatpush3.bf16.msra.mxu1 %v913_v38 }
  0x1a   :  { %890 = vmatprep.subr.bf16.mxu0 %v889_v33  ;;  %918 = vmatprep.subr.bf16.mxu1 %v917_v42 }
  0x1d   :  { %892 = vmatpush3.bf16.msra.mxu0 %v889_v33  ;;  %920 = vmatpush3.bf16.msra.mxu1 %v917_v42 }
  0x1e   :  { %894 = vmatprep.subr.bf16.mxu0 %v893_v39  ;;  %922 = vmatprep.subr.bf16.mxu1 %v921_v46 }
  0x21   :  { %896 = vmatpush3.bf16.msra.mxu0 %v893_v39  ;;  %924 = vmatpush3.bf16.msra.mxu1 %v921_v46 }
  0x22   :  { %926 = vmatprep.subr.bf16.mxu1 %v925_v63  ;;  %930 = vmatprep.subr.bf16.mxu0 %v929_v3 }
  0x24   :  { %730 = vmatmul.mubr.f32.vlgmr.msra.gmra.mrb[0].mxu0 %v27_v45 }
  0x25   :  { %732 = vmatprep.mubr.f32.mxu0 %v28_v47  ;;  %928 = vmatpush3.bf16.msra.mxu1 %v925_v63 }
  0x26   :  { %961 = vmatprep.subr.bf16.mxu1 %v929_v3  ;;  %932 = vmatpush3.bf16.msra.mxu0 %v929_v3 }
  0x27   :  { %934 = vmatprep.subr.bf16.mxu0 %v933_v5 }
  0x28   :  { %733 = vmatmul.mubr.f32.gmra.mrb[2].mxu0 %v29_v48 }
  0x29   :  { %735 = vmatprep.mubr.f32.mxu0 %v30_v49 }
  0x2a   :  { %936 = vmatpush3.bf16.msra.mxu0 %v933_v5 }
  0x2b   :  { %938 = vmatprep.subr.bf16.mxu0 %v937_v8 }
  0x2c   :  { %736 = vmatmul.mubr.f32.gmra.mrb[4].mxu0 %v31_v50 }
  0x2d   :  { %738 = vmatprep.mubr.f32.mxu0 %v32_v51 }
  0x2e   :  { %940 = vmatpush3.bf16.msra.mxu0 %v937_v8 }
  0x2f   :  { %942 = vmatprep.subr.bf16.mxu0 %v1185_v11 }
  0x30   :  { %739 = vmatmul.mubr.f32.gmra.mrb[6].mxu0 %v33_v52 }
  0x31   :  { %741 = vmatprep.mubr.f32.mxu0 %v34_v53 }
  0x32   :  { %944 = vmatpush3.bf16.msra.mxu0 %v1185_v11 }
  0x33   :  { %946 = vmatprep.subr.bf16.mxu0 %v1194_v14 }
  0x34   :  { %742 = vmatmul.mubr.f32.gmra.mrb[8].mxu0 %v35_v54 }
  0x35   :  { %744 = vmatprep.mubr.f32.mxu0 %v36_v55 }
  0x36   :  { %948 = vmatpush3.bf16.msra.mxu0 %v1194_v14 }
  0x37   :  { %950 = vmatprep.subr.bf16.mxu0 %v1204_v17 }
  0x38   :  { %745 = vmatmul.mubr.f32.gmra.mrb[10].mxu0 %v37_v56 }
  0x39   :  { %747 = vmatprep.mubr.f32.mxu0 %v38_v57 }
  0x3a   :  { %952 = vmatpush3.bf16.msra.mxu0 %v1204_v17 }
  0x3b   :  { %954 = vmatprep.subr.bf16.mxu0 %v1214_v20 }
  0x3c   :  { %748 = vmatmul.mubr.f32.gmra.mrb[12].mxu0 %v39_v58 }
  0x3d   :  { %750 = vmatprep.mubr.f32.mxu0 %v40_v59 }
  0x3e   :  { %956 = vmatpush3.bf16.msra.mxu0 %v1214_v20 }
  0x40   :  { %751 = vmatmul.mubr.f32.gmra.mrb[14].mxu0 %v41_v60 }
  0xf7   :  { %v731_v22 = vpop.f32.mrb[0].mxu0 }
  0xf8   :  { %v137_v23 = vadd.f32 %v731_v22, %v1222_v21  ;;  %v131_v24 = vpop.f32.mrb[1].mxu0 }
  0xf9   :  { %v132_v25 = vadd.f32 %v1222_v21, %v131_v24 }
  0xfa   :  { %v211_v28 = vmax.f32 %v137_v23, 0.0 }
  0xfb   :  { %v734_v26 = vpop.f32.mrb[2].mxu0  ;;  %v210_v27 = vmax.f32 %v132_v25, 0.0 }
  0xfc   :  { %v147_v29 = vadd.f32 %v734_v26, %v1222_v21  ;;  %v141_v30 = vpop.f32.mrb[3].mxu0 }
  0xfd   :  { %v142_v31 = vadd.f32 %v1222_v21, %v141_v30  ;;  %785 = vmatprep.mubr.f32.mxu1 %v210_v27 }
  0xfe   :  { %786 = vmatmul.mubr.f32.vlgmr.msra.gmra.mrb[0].mxu1 %v211_v28  ;;  %v213_v34 = vmax.f32 %v147_v29, 0.0 }
  0xff   :  { %v212_v32 = vmax.f32 %v142_v31, 0.0  ;;  %v737_v33 = vpop.f32.mrb[4].mxu0  ;;  %969 = vmatpush3.bf16.msra.mxu1 %v929_v3 }
 0x100   :  { %v157_v35 = vadd.f32 %v737_v33, %v1222_v21  ;;  %v151_v36 = vpop.f32.mrb[5].mxu0  ;;  %962 = vmatprep.subr.bf16.mxu1 %v933_v5 }
 0x101   :  { %v152_v37 = vadd.f32 %v1222_v21, %v151_v36  ;;  %788 = vmatprep.mubr.f32.mxu1 %v212_v32 }
 0x102   :  { %789 = vmatmul.mubr.f32.gmra.mrb[2].mxu1 %v213_v34  ;;  %v215_v40 = vmax.f32 %v157_v35, 0.0 }
 0x103   :  { %v214_v38 = vmax.f32 %v152_v37, 0.0  ;;  %v740_v39 = vpop.f32.mrb[6].mxu0  ;;  %970 = vmatpush3.bf16.msra.mxu1 %v933_v5 }
 0x104   :  { %v167_v41 = vadd.f32 %v740_v39, %v1222_v21  ;;  %v161_v42 = vpop.f32.mrb[7].mxu0  ;;  %963 = vmatprep.subr.bf16.mxu1 %v937_v8 }
 0x105   :  { %v162_v43 = vadd.f32 %v1222_v21, %v161_v42  ;;  %791 = vmatprep.mubr.f32.mxu1 %v214_v38 }
 0x106   :  { %792 = vmatmul.mubr.f32.gmra.mrb[4].mxu1 %v215_v40  ;;  %v217_v46 = vmax.f32 %v167_v41, 0.0 }
 0x107   :  { %v216_v44 = vmax.f32 %v162_v43, 0.0  ;;  %v743_v45 = vpop.f32.mrb[8].mxu0  ;;  %971 = vmatpush3.bf16.msra.mxu1 %v937_v8  ;;  %v957_v8 = vpack.c.bf16 %v425_v7, %v424_v6 }
 0x108   :  { %v177_v47 = vadd.f32 %v743_v45, %v1222_v21  ;;  %v171_v48 = vpop.f32.mrb[9].mxu0  ;;  %964 = vmatprep.subr.bf16.mxu1 %v1185_v11 }
 0x109   :  { %v172_v49 = vadd.f32 %v1222_v21, %v171_v48  ;;  %794 = vmatprep.mubr.f32.mxu1 %v216_v44  ;;  %958 = vmatprep.subr.bf16.mxu0 %v957_v8 }
 0x10a   :  { %795 = vmatmul.mubr.f32.gmra.mrb[6].mxu1 %v217_v46  ;;  %v219_v52 = vmax.f32 %v177_v47, 0.0  ;;  %960 = vmatpush3.bf16.msra.mxu0 %v957_v8 }
 0x10b   :  { %v218_v50 = vmax.f32 %v172_v49, 0.0  ;;  %v746_v51 = vpop.f32.mrb[10].mxu0  ;;  %972 = vmatpush3.bf16.msra.mxu1 %v1185_v11 }
 0x10c   :  { %v187_v53 = vadd.f32 %v746_v51, %v1222_v21  ;;  %v181_v54 = vpop.f32.mrb[11].mxu0  ;;  %965 = vmatprep.subr.bf16.mxu1 %v1194_v14 }
 0x10d   :  { %v182_v55 = vadd.f32 %v1222_v21, %v181_v54  ;;  %797 = vmatprep.mubr.f32.mxu1 %v218_v50 }
 0x10e   :  { %798 = vmatmul.mubr.f32.gmra.mrb[8].mxu1 %v219_v52  ;;  %v221_v58 = vmax.f32 %v187_v53, 0.0 }
 0x10f   :  { %v220_v56 = vmax.f32 %v182_v55, 0.0  ;;  %v749_v57 = vpop.f32.mrb[12].mxu0  ;;  %973 = vmatpush3.bf16.msra.mxu1 %v1194_v14 }
 0x110   :  { %v197_v59 = vadd.f32 %v749_v57, %v1222_v21  ;;  %v191_v60 = vpop.f32.mrb[13].mxu0  ;;  %966 = vmatprep.subr.bf16.mxu1 %v1204_v17 }
 0x111   :  { %v192_v61 = vadd.f32 %v1222_v21, %v191_v60  ;;  %800 = vmatprep.mubr.f32.mxu1 %v220_v56 }
 0x112   :  { %801 = vmatmul.mubr.f32.gmra.mrb[10].mxu1 %v221_v58  ;;  %v223_v0 = vmax.f32 %v197_v59, 0.0  ;;  %v600_v58 = vld [vmem:[%s1314_s6] ss:$0 sm:$0xff] }
 0x113   :  { %v222_v62 = vmax.f32 %v192_v61, 0.0  ;;  %v752_v63 = vpop.f32.mrb[14].mxu0  ;;  %974 = vmatpush3.bf16.msra.mxu1 %v1204_v17 }
 0x114   :  { %v207_v1 = vadd.f32 %v752_v63, %v1222_v21  ;;  %v201_v2 = vpop.f32.mrb[15].mxu0  ;;  %967 = vmatprep.subr.bf16.mxu1 %v1214_v20 }
 0x115   :  { %v202_v3 = vadd.f32 %v1222_v21, %v201_v2  ;;  %803 = vmatprep.mubr.f32.mxu1 %v222_v62 }
 0x116   :  { %804 = vmatmul.mubr.f32.gmra.mrb[12].mxu1 %v223_v0  ;;  %v225_v5 = vmax.f32 %v207_v1, 0.0 }
 0x117   :  { %v224_v4 = vmax.f32 %v202_v3, 0.0  ;;  %975 = vmatpush3.bf16.msra.mxu1 %v1214_v20 }
 0x118   :  { %968 = vmatprep.subr.bf16.mxu1 %v957_v8 }
 0x119   :  { %806 = vmatprep.mubr.f32.mxu1 %v224_v4 }
 0x11a   :  { %807 = vmatmul.mubr.f32.gmra.mrb[14].mxu1 %v225_v5 }
 0x11b   :  { %976 = vmatpush3.bf16.msra.mxu1 %v957_v8 }
 0x1d1   :  { %v787_v10 = vpop.f32.mrb[0].mxu1 }
 0x1d2   :  { %v321_v11 = vadd.f32 %v787_v10, %v599_v9  ;;  %v315_v12 = vpop.f32.mrb[1].mxu1 }
 0x1d3   :  { %v316_v13 = vadd.f32 %v599_v9, %v315_v12 }
 0x1d4   :  { %v395_v16 = vmax.f32 %v321_v11, 0.0 }
 0x1d5   :  { %v394_v14 = vmax.f32 %v316_v13, 0.0  ;;  %v790_v15 = vpop.f32.mrb[2].mxu1 }
 0x1d6   :  { %v331_v17 = vadd.f32 %v790_v15, %v599_v9  ;;  %v325_v18 = vpop.f32.mrb[3].mxu1 }
 0x1d7   :  { %v326_v19 = vadd.f32 %v599_v9, %v325_v18  ;;  %841 = vmatprep.mubr.f32.mxu0 %v394_v14 }
 0x1d8   :  { %842 = vmatmul.mubr.f32.vlgmr.msra.gmra.mrb[16].mxu0 %v395_v16  ;;  %v397_v22 = vmax.f32 %v331_v17, 0.0 }
 0x1d9   :  { %v396_v20 = vmax.f32 %v326_v19, 0.0  ;;  %v793_v21 = vpop.f32.mrb[4].mxu1 }
 0x1da   :  { %v341_v23 = vadd.f32 %v793_v21, %v599_v9  ;;  %v335_v24 = vpop.f32.mrb[5].mxu1 }
 0x1db   :  { %v336_v25 = vadd.f32 %v599_v9, %v335_v24  ;;  %844 = vmatprep.mubr.f32.mxu0 %v396_v20 }
 0x1dc   :  { %845 = vmatmul.mubr.f32.gmra.mrb[18].mxu0 %v397_v22  ;;  %v399_v28 = vmax.f32 %v341_v23, 0.0 }
 0x1dd   :  { %v398_v26 = vmax.f32 %v336_v25, 0.0  ;;  %v796_v27 = vpop.f32.mrb[6].mxu1 }
 0x1de   :  { %v351_v29 = vadd.f32 %v796_v27, %v599_v9  ;;  %v345_v30 = vpop.f32.mrb[7].mxu1 }
 0x1df   :  { %v346_v31 = vadd.f32 %v599_v9, %v345_v30  ;;  %847 = vmatprep.mubr.f32.mxu0 %v398_v26 }
 0x1e0   :  { %848 = vmatmul.mubr.f32.gmra.mrb[20].mxu0 %v399_v28  ;;  %v401_v34 = vmax.f32 %v351_v29, 0.0 }
 0x1e1   :  { %v400_v32 = vmax.f32 %v346_v31, 0.0  ;;  %v799_v33 = vpop.f32.mrb[8].mxu1 }
 0x1e2   :  { %v361_v35 = vadd.f32 %v799_v33, %v599_v9  ;;  %v355_v36 = vpop.f32.mrb[9].mxu1 }
 0x1e3   :  { %v356_v37 = vadd.f32 %v599_v9, %v355_v36  ;;  %850 = vmatprep.mubr.f32.mxu0 %v400_v32 }
 0x1e4   :  { %851 = vmatmul.mubr.f32.gmra.mrb[22].mxu0 %v401_v34  ;;  %v403_v40 = vmax.f32 %v361_v35, 0.0 }
 0x1e5   :  { %v402_v38 = vmax.f32 %v356_v37, 0.0  ;;  %v802_v39 = vpop.f32.mrb[10].mxu1 }
 0x1e6   :  { %v371_v41 = vadd.f32 %v802_v39, %v599_v9  ;;  %v365_v42 = vpop.f32.mrb[11].mxu1 }
 0x1e7   :  { %v366_v43 = vadd.f32 %v599_v9, %v365_v42  ;;  %853 = vmatprep.mubr.f32.mxu1 %v402_v38 }
 0x1e8   :  { %854 = vmatmul.mubr.f32.vlgmr.msra.gmra.mrb[16].mxu1 %v403_v40  ;;  %v405_v46 = vmax.f32 %v371_v41, 0.0 }
 0x1e9   :  { %v404_v44 = vmax.f32 %v366_v43, 0.0  ;;  %v805_v45 = vpop.f32.mrb[12].mxu1 }
 0x1ea   :  { %v381_v47 = vadd.f32 %v805_v45, %v599_v9  ;;  %v375_v48 = vpop.f32.mrb[13].mxu1 }
 0x1eb   :  { %v376_v49 = vadd.f32 %v599_v9, %v375_v48  ;;  %856 = vmatprep.mubr.f32.mxu1 %v404_v44 }
 0x1ec   :  { %857 = vmatmul.mubr.f32.gmra.mrb[18].mxu1 %v405_v46  ;;  %v407_v52 = vmax.f32 %v381_v47, 0.0 }
 0x1ed   :  { %v406_v50 = vmax.f32 %v376_v49, 0.0  ;;  %v808_v51 = vpop.f32.mrb[14].mxu1 }
 0x1ee   :  { %v391_v53 = vadd.f32 %v808_v51, %v599_v9  ;;  %v385_v54 = vpop.f32.mrb[15].mxu1 }
 0x1ef   :  { %v386_v55 = vadd.f32 %v599_v9, %v385_v54  ;;  %859 = vmatprep.mubr.f32.mxu1 %v406_v50 }
 0x1f0   :  { %860 = vmatmul.mubr.f32.gmra.mrb[20].mxu1 %v407_v52  ;;  %v409_v57 = vmax.f32 %v391_v53, 0.0 }
 0x1f1   :  { %v408_v56 = vmax.f32 %v386_v55, 0.0 }
 0x1f3   :  { %862 = vmatprep.mubr.f32.mxu1 %v408_v56 }
 0x1f4   :  { %863 = vmatmul.mubr.f32.gmra.mrb[22].mxu1 %v409_v57 }
 0x2ab   :  { %v843_v59 = vpop.f32.mrb[16].mxu0 }
 0x2ac   :  { %v505_v60 = vadd.f32 %v843_v59, %v600_v58  ;;  %v499_v61 = vpop.f32.mrb[17].mxu0 }
 0x2ad   :  { %v500_v62 = vadd.f32 %v600_v58, %v499_v61 }
 0x2ae   :  { %579 = vst [vmem:[%s1315_s7 + $0x8] sm:$0xff] %v505_v60 }
 0x2af   :  { %578 = vst [vmem:[%s1315_s7] sm:$0xff] %v500_v62  ;;  %v846_v63 = vpop.f32.mrb[18].mxu0 }
 0x2b0   :  { %v515_v0 = vadd.f32 %v846_v63, %v600_v58  ;;  %v509_v1 = vpop.f32.mrb[19].mxu0 }
 0x2b1   :  { %v510_v2 = vadd.f32 %v600_v58, %v509_v1 }
 0x2b2   :  { %581 = vst [vmem:[%s1315_s7 + $0x18] sm:$0xff] %v515_v0 }
 0x2b3   :  { %580 = vst [vmem:[%s1315_s7 + $0x10] sm:$0xff] %v510_v2  ;;  %v849_v3 = vpop.f32.mrb[20].mxu0 }
 0x2b4   :  { %v525_v4 = vadd.f32 %v849_v3, %v600_v58  ;;  %v519_v5 = vpop.f32.mrb[21].mxu0 }
 0x2b5   :  { %v520_v6 = vadd.f32 %v600_v58, %v519_v5 }
 0x2b6   :  { %583 = vst [vmem:[%s1315_s7 + $0x28] sm:$0xff] %v525_v4 }
 0x2b7   :  { %582 = vst [vmem:[%s1315_s7 + $0x20] sm:$0xff] %v520_v6  ;;  %v852_v7 = vpop.f32.mrb[22].mxu0 }
 0x2b8   :  { %v535_v8 = vadd.f32 %v852_v7, %v600_v58  ;;  %v529_v9 = vpop.f32.mrb[23].mxu0 }
 0x2b9   :  { %v530_v10 = vadd.f32 %v600_v58, %v529_v9 }
 0x2ba   :  { %585 = vst [vmem:[%s1315_s7 + $0x38] sm:$0xff] %v535_v8 }
 0x2bb   :  { %584 = vst [vmem:[%s1315_s7 + $0x30] sm:$0xff] %v530_v10  ;;  %v855_v11 = vpop.f32.mrb[16].mxu1 }
 0x2bc   :  { %v545_v12 = vadd.f32 %v855_v11, %v600_v58  ;;  %v539_v13 = vpop.f32.mrb[17].mxu1 }
 0x2bd   :  { %v540_v14 = vadd.f32 %v600_v58, %v539_v13 }
 0x2be   :  { %587 = vst [vmem:[%s1315_s7 + $0x48] sm:$0xff] %v545_v12 }
 0x2bf   :  { %586 = vst [vmem:[%s1315_s7 + $0x40] sm:$0xff] %v540_v14  ;;  %v858_v15 = vpop.f32.mrb[18].mxu1 }
 0x2c0   :  { %v555_v16 = vadd.f32 %v858_v15, %v600_v58  ;;  %v549_v17 = vpop.f32.mrb[19].mxu1 }
 0x2c1   :  { %v550_v18 = vadd.f32 %v600_v58, %v549_v17 }
 0x2c2   :  { %589 = vst [vmem:[%s1315_s7 + $0x58] sm:$0xff] %v555_v16 }
 0x2c3   :  { %588 = vst [vmem:[%s1315_s7 + $0x50] sm:$0xff] %v550_v18  ;;  %v861_v19 = vpop.f32.mrb[20].mxu1 }
 0x2c4   :  { %v565_v20 = vadd.f32 %v861_v19, %v600_v58  ;;  %v559_v21 = vpop.f32.mrb[21].mxu1 }
 0x2c5   :  { %v560_v22 = vadd.f32 %v600_v58, %v559_v21 }
 0x2c6   :  { %591 = vst [vmem:[%s1315_s7 + $0x68] sm:$0xff] %v565_v20 }
 0x2c7   :  { %590 = vst [vmem:[%s1315_s7 + $0x60] sm:$0xff] %v560_v22  ;;  %v864_v23 = vpop.f32.mrb[22].mxu1 }
 0x2c8   :  { %v575_v24 = vadd.f32 %v864_v23, %v600_v58  ;;  %v569_v25 = vpop.f32.mrb[23].mxu1 }
 0x2c9   :  { %v570_v26 = vadd.f32 %v600_v58, %v569_v25 }
 0x2ca   :  { %593 = vst [vmem:[%s1315_s7 + $0x78] sm:$0xff] %v575_v24 }
 0x2cb   :  { %592 = vst [vmem:[%s1315_s7 + $0x70] sm:$0xff] %v570_v26 }

</bundles_post_ra>
